<compile_context>
chip_gen: v6e
topology: v6e:2x2x1
jax: 0.10.0
libtpu: 0.0.40
codegen_flags: <defaults>
</compile_context>

<pallas_src>
import functools

import jax
import jax.numpy as jnp
from jax.experimental import pallas as pl
from jax.experimental.pallas import tpu as pltpu


def _round_up(x, m):
    return ((x + m - 1) // m) * m


def _highway_kernel(x_ref, w_ref, b_ref, o_ref, *, num_layers, num_units):
    # x_ref : (1, C, tT)   input slab (channels x time-tile) of one batch elem
    # w_ref : (L, 2C, C)   fused [linear; gate] weights, bf16, (out, in) layout
    # b_ref : (L, 2C, 1)   fused biases, f32 (broadcast along lanes)
    # o_ref : (1, C, tT)
    C = num_units
    out = x_ref[0].astype(jnp.float32)                        # (C, tT) f32
    for l in range(num_layers):
        pre = jnp.dot(w_ref[l], out.astype(jnp.bfloat16),
                      preferred_element_type=jnp.float32)     # (2C, tT) f32 acc
        pre = pre + b_ref[l]                                   # bias broadcast
        h = jnp.maximum(pre[:C], 0.0)                          # relu    (f32 VPU)
        t = jax.nn.sigmoid(pre[C:])                            # gate    (f32 EUP)
        out = out + t * (h - out)                              # highway update
    o_ref[0] = out.astype(o_ref.dtype)


def highwaynet_forward(x_nct, linear_w, linear_b, gate_w, gate_b, *, t_tile=512):
    """Highwaynet forward.

    x_nct:    (B, C, T) activations, NCT layout (PyTorch time_dim=2).
    linear_w: (L, C, C) nn.Linear weights, PyTorch (out, in) layout.
    linear_b: (L, C)
    gate_w:   (L, C, C)
    gate_b:   (L, C)
    Returns (B, C, T).
    """
    assert t_tile % 128 == 0, "time tile must be lane-aligned"
    B, C, T = x_nct.shape
    L = linear_w.shape[0]

    # Time tiling: full extent when T is small, otherwise a lane-dense
    # multiple-of-128 tile; padded time columns are computed then discarded.
    tT = t_tile if T >= t_tile else T
    T_pad = _round_up(T, tT)
    x_in = x_nct
    if T_pad != T:
        x_in = jnp.pad(x_nct, ((0, 0), (0, 0), (0, T_pad - T)))

    # Fuse linear + gate projections: one matmul per layer, 2C output rows.
    w_cat = jnp.concatenate([linear_w, gate_w], axis=1).astype(jnp.bfloat16)  # (L,2C,C)
    b_cat = jnp.concatenate([linear_b, gate_b], axis=1).astype(jnp.float32)
    b_cat = b_cat.reshape(L, 2 * C, 1)                                        # (L,2C,1)

    kernel = functools.partial(_highway_kernel, num_layers=L, num_units=C)

    n_tok = B * T_pad
    cost = pl.CostEstimate(
        flops=4 * L * n_tok * C * C,                  # 2 CxC matmuls / layer / token
        transcendentals=L * n_tok * C,                # sigmoid
        bytes_accessed=2 * 4 * n_tok * C + 2 * L * 2 * C * C + 4 * L * 2 * C,
    )

    # Rough VMEM footprint: double-buffered (1,C,tT) in/out f32 slabs + the
    # (once-DMA'd, but still double-buffered) bf16 fused weights and f32 bias.
    est_vmem = (4 * (C * tT * 4)
                + 2 * (L * 2 * C * C * 2)
                + 2 * (L * 2 * C * 128 * 4))
    vmem_limit = int(min(max(2 * est_vmem, 32 * 1024 * 1024), 96 * 1024 * 1024))
    # TODO(synk): for very large C (>=1024) add a layer grid axis (or
    # pipeline_mode=pl.Buffered(1) on the weight spec) so the fused weights
    # are not double-buffered -- needed to fit v7x's 64 MiB VMEM.

    out = pl.pallas_call(
        kernel,
        out_shape=jax.ShapeDtypeStruct((B, C, T_pad), x_nct.dtype),
        grid_spec=pltpu.PrefetchScalarGridSpec(
            num_scalar_prefetch=0,
            grid=(B, T_pad // tT),
            in_specs=[
                pl.BlockSpec((1, C, tT), lambda b, j: (b, 0, j)),
                pl.BlockSpec((L, 2 * C, C), lambda b, j: (0, 0, 0)),
                pl.BlockSpec((L, 2 * C, 1), lambda b, j: (0, 0, 0)),
            ],
            out_specs=pl.BlockSpec((1, C, tT), lambda b, j: (b, 0, j)),
        ),
        compiler_params=pltpu.CompilerParams(
            dimension_semantics=("parallel", "parallel"),
            vmem_limit_bytes=vmem_limit,
        ),
        cost_estimate=cost,
    )(x_in, w_cat, b_cat)

    if T_pad != T:
        out = out[:, :, :T]
    return out


def _reference_forward(x_nct, linear_w, linear_b, gate_w, gate_b):
    """Pure-JAX f32 reference replicating the PyTorch module exactly."""
    out = jnp.transpose(x_nct, (0, 2, 1)).astype(jnp.float32)  # (B, T, C)
    L = linear_w.shape[0]
    for l in range(L):
        h = jax.nn.relu(out @ linear_w[l].T + linear_b[l])
        t = jax.nn.sigmoid(out @ gate_w[l].T + gate_b[l])
        out = h * t + out * (1.0 - t)
    return jnp.transpose(out, (0, 2, 1))


if __name__ == "__main__":
    L = 4                       # num_layers
    key = jax.random.PRNGKey(0)

    # Deterministic nn.Linear-style init: uniform(-1/sqrt(C), 1/sqrt(C)).
    C = 32                      # num_units
    bound = 1.0 / (C ** 0.5)
    kws = jax.random.split(jax.random.fold_in(key, 0), 4)
    linear_w = jax.random.uniform(kws[0], (L, C, C), jnp.float32, -bound, bound)
    linear_b = jax.random.uniform(kws[1], (L, C), jnp.float32, -bound, bound)
    gate_w = jax.random.uniform(kws[2], (L, C, C), jnp.float32, -bound, bound)
    gate_b = jax.random.uniform(kws[3], (L, C), jnp.float32, -bound, bound)

    # Case 1: small shapes straight from the module (B, num_units, T).
    B, T = 2, 8
    x = jax.random.normal(jax.random.fold_in(key, 1), (B, C, T), jnp.float32)
    out = jax.block_until_ready(highwaynet_forward(x, linear_w, linear_b, gate_w, gate_b))
    ref = _reference_forward(x, linear_w, linear_b, gate_w, gate_b)
    assert out.shape == (B, C, T), out.shape
    # bf16 matmul operands (f32 accumulate) -> loose-but-safe tolerance.
    assert jnp.allclose(out, ref, atol=2e-2, rtol=2e-2), float(jnp.max(jnp.abs(out - ref)))

    # Case 2: exercises the time-tiling / padding path (T > tile, T % 128 != 0).
    B2, T2 = 2, 300
    x2 = jax.random.normal(jax.random.fold_in(key, 2), (B2, C, T2), jnp.float32)
    out2 = jax.block_until_ready(
        highwaynet_forward(x2, linear_w, linear_b, gate_w, gate_b, t_tile=128))
    ref2 = _reference_forward(x2, linear_w, linear_b, gate_w, gate_b)
    assert out2.shape == (B2, C, T2), out2.shape
    assert jnp.allclose(out2, ref2, atol=2e-2, rtol=2e-2), float(jnp.max(jnp.abs(out2 - ref2)))

    print("KERNEL_OK")
</pallas_src>

<mosaic_0001>
module attributes {stable_mosaic.version = 11 : i64} {
  func.func @_highway_kernel(%arg0: i32, %arg1: i32, %arg2: memref<1x32x8xf32, #tpu.memory_space<vmem>>, %arg3: memref<4x64x32xbf16, #tpu.memory_space<vmem>>, %arg4: memref<4x64x1xf32, #tpu.memory_space<vmem>>, %arg5: memref<1x32x8xf32, #tpu.memory_space<vmem>>) attributes {dimension_semantics = [#tpu.dimension_semantics<parallel>, #tpu.dimension_semantics<parallel>], iteration_bounds = array<i64: 2, 1>, scalar_prefetch = 0 : i64, scratch_operands = 0 : i64, tpu.core_type = #tpu.core_type<tc>, window_params = [{transform_indices = @transform_0, window_bounds = array<i64: 1, 32, 8>}, {pipeline_mode = #tpu.pipeline_mode<synchronous>, transform_indices = @transform_1, window_bounds = array<i64: 4, 64, 32>}, {pipeline_mode = #tpu.pipeline_mode<synchronous>, transform_indices = @transform_2, window_bounds = array<i64: 4, 64, 1>}, {transform_indices = @transform_3, window_bounds = array<i64: 1, 32, 8>}]} {
    %c0 = arith.constant 0 : index
    %c0_0 = arith.constant 0 : index
    %c0_1 = arith.constant 0 : index
    %0 = vector.load %arg2[%c0, %c0_0, %c0_1] : memref<1x32x8xf32, #tpu.memory_space<vmem>>, vector<1x32x8xf32>
    %1 = vector.shape_cast %0 : vector<1x32x8xf32> to vector<32x8xf32>
    %c0_2 = arith.constant 0 : index
    %c0_3 = arith.constant 0 : index
    %c0_4 = arith.constant 0 : index
    %2 = vector.load %arg3[%c0_2, %c0_3, %c0_4] : memref<4x64x32xbf16, #tpu.memory_space<vmem>>, vector<1x64x32xbf16>
    %3 = vector.shape_cast %2 : vector<1x64x32xbf16> to vector<64x32xbf16>
    %4 = arith.truncf %1 : vector<32x8xf32> to vector<32x8xbf16>
    %cst = arith.constant dense<0.000000e+00> : vector<64x8xf32>
    %5 = tpu.matmul %3, %4, %cst {dimension_numbers = #tpu.dot_dimension_numbers<[1], [0], [0], [1], [0, 0, 1, 1], [], []>} : vector<64x32xbf16>, vector<32x8xbf16>, vector<64x8xf32> -> vector<64x8xf32>
    %c0_5 = arith.constant 0 : index
    %c0_6 = arith.constant 0 : index
    %c0_7 = arith.constant 0 : index
    %6 = vector.load %arg4[%c0_5, %c0_6, %c0_7] : memref<4x64x1xf32, #tpu.memory_space<vmem>>, vector<1x64x1xf32>
    %7 = vector.shape_cast %6 : vector<1x64x1xf32> to vector<64x1xf32>
    %8 = vector.broadcast %7 : vector<64x1xf32> to vector<64x8xf32>
    %9 = arith.addf %5, %8 : vector<64x8xf32>
    %10 = vector.extract_strided_slice %9 {offsets = [0, 0], sizes = [32, 8], strides = [1, 1]} : vector<64x8xf32> to vector<32x8xf32>
    %cst_8 = arith.constant 0.000000e+00 : f32
    %11 = vector.broadcast %cst_8 : f32 to vector<32x8xf32>
    %12 = arith.maximumf %10, %11 : vector<32x8xf32>
    %13 = vector.extract_strided_slice %9 {offsets = [32, 0], sizes = [32, 8], strides = [1, 1]} : vector<64x8xf32> to vector<32x8xf32>
    %14 = arith.negf %13 : vector<32x8xf32>
    %15 = math.exp %14 : vector<32x8xf32>
    %cst_9 = arith.constant 1.000000e+00 : f32
    %16 = vector.broadcast %cst_9 : f32 to vector<32x8xf32>
    %17 = arith.addf %16, %15 : vector<32x8xf32>
    %18 = arith.divf %16, %17 : vector<32x8xf32>
    %19 = arith.subf %12, %1 : vector<32x8xf32>
    %20 = arith.mulf %18, %19 : vector<32x8xf32>
    %21 = arith.addf %1, %20 : vector<32x8xf32>
    %c1 = arith.constant 1 : index
    %c0_10 = arith.constant 0 : index
    %c0_11 = arith.constant 0 : index
    %22 = vector.load %arg3[%c1, %c0_10, %c0_11] : memref<4x64x32xbf16, #tpu.memory_space<vmem>>, vector<1x64x32xbf16>
    %23 = vector.shape_cast %22 : vector<1x64x32xbf16> to vector<64x32xbf16>
    %24 = arith.truncf %21 : vector<32x8xf32> to vector<32x8xbf16>
    %cst_12 = arith.constant dense<0.000000e+00> : vector<64x8xf32>
    %25 = tpu.matmul %23, %24, %cst_12 {dimension_numbers = #tpu.dot_dimension_numbers<[1], [0], [0], [1], [0, 0, 1, 1], [], []>} : vector<64x32xbf16>, vector<32x8xbf16>, vector<64x8xf32> -> vector<64x8xf32>
    %c1_13 = arith.constant 1 : index
    %c0_14 = arith.constant 0 : index
    %c0_15 = arith.constant 0 : index
    %26 = vector.load %arg4[%c1_13, %c0_14, %c0_15] : memref<4x64x1xf32, #tpu.memory_space<vmem>>, vector<1x64x1xf32>
    %27 = vector.shape_cast %26 : vector<1x64x1xf32> to vector<64x1xf32>
    %28 = vector.broadcast %27 : vector<64x1xf32> to vector<64x8xf32>
    %29 = arith.addf %25, %28 : vector<64x8xf32>
    %30 = vector.extract_strided_slice %29 {offsets = [0, 0], sizes = [32, 8], strides = [1, 1]} : vector<64x8xf32> to vector<32x8xf32>
    %cst_16 = arith.constant 0.000000e+00 : f32
    %31 = vector.broadcast %cst_16 : f32 to vector<32x8xf32>
    %32 = arith.maximumf %30, %31 : vector<32x8xf32>
    %33 = vector.extract_strided_slice %29 {offsets = [32, 0], sizes = [32, 8], strides = [1, 1]} : vector<64x8xf32> to vector<32x8xf32>
    %34 = arith.negf %33 : vector<32x8xf32>
    %35 = math.exp %34 : vector<32x8xf32>
    %cst_17 = arith.constant 1.000000e+00 : f32
    %36 = vector.broadcast %cst_17 : f32 to vector<32x8xf32>
    %37 = arith.addf %36, %35 : vector<32x8xf32>
    %38 = arith.divf %36, %37 : vector<32x8xf32>
    %39 = arith.subf %32, %21 : vector<32x8xf32>
    %40 = arith.mulf %38, %39 : vector<32x8xf32>
    %41 = arith.addf %21, %40 : vector<32x8xf32>
    %c2 = arith.constant 2 : index
    %c0_18 = arith.constant 0 : index
    %c0_19 = arith.constant 0 : index
    %42 = vector.load %arg3[%c2, %c0_18, %c0_19] : memref<4x64x32xbf16, #tpu.memory_space<vmem>>, vector<1x64x32xbf16>
    %43 = vector.shape_cast %42 : vector<1x64x32xbf16> to vector<64x32xbf16>
    %44 = arith.truncf %41 : vector<32x8xf32> to vector<32x8xbf16>
    %cst_20 = arith.constant dense<0.000000e+00> : vector<64x8xf32>
    %45 = tpu.matmul %43, %44, %cst_20 {dimension_numbers = #tpu.dot_dimension_numbers<[1], [0], [0], [1], [0, 0, 1, 1], [], []>} : vector<64x32xbf16>, vector<32x8xbf16>, vector<64x8xf32> -> vector<64x8xf32>
    %c2_21 = arith.constant 2 : index
    %c0_22 = arith.constant 0 : index
    %c0_23 = arith.constant 0 : index
    %46 = vector.load %arg4[%c2_21, %c0_22, %c0_23] : memref<4x64x1xf32, #tpu.memory_space<vmem>>, vector<1x64x1xf32>
    %47 = vector.shape_cast %46 : vector<1x64x1xf32> to vector<64x1xf32>
    %48 = vector.broadcast %47 : vector<64x1xf32> to vector<64x8xf32>
    %49 = arith.addf %45, %48 : vector<64x8xf32>
    %50 = vector.extract_strided_slice %49 {offsets = [0, 0], sizes = [32, 8], strides = [1, 1]} : vector<64x8xf32> to vector<32x8xf32>
    %cst_24 = arith.constant 0.000000e+00 : f32
    %51 = vector.broadcast %cst_24 : f32 to vector<32x8xf32>
    %52 = arith.maximumf %50, %51 : vector<32x8xf32>
    %53 = vector.extract_strided_slice %49 {offsets = [32, 0], sizes = [32, 8], strides = [1, 1]} : vector<64x8xf32> to vector<32x8xf32>
    %54 = arith.negf %53 : vector<32x8xf32>
    %55 = math.exp %54 : vector<32x8xf32>
    %cst_25 = arith.constant 1.000000e+00 : f32
    %56 = vector.broadcast %cst_25 : f32 to vector<32x8xf32>
    %57 = arith.addf %56, %55 : vector<32x8xf32>
    %58 = arith.divf %56, %57 : vector<32x8xf32>
    %59 = arith.subf %52, %41 : vector<32x8xf32>
    %60 = arith.mulf %58, %59 : vector<32x8xf32>
    %61 = arith.addf %41, %60 : vector<32x8xf32>
    %c3 = arith.constant 3 : index
    %c0_26 = arith.constant 0 : index
    %c0_27 = arith.constant 0 : index
    %62 = vector.load %arg3[%c3, %c0_26, %c0_27] : memref<4x64x32xbf16, #tpu.memory_space<vmem>>, vector<1x64x32xbf16>
    %63 = vector.shape_cast %62 : vector<1x64x32xbf16> to vector<64x32xbf16>
    %64 = arith.truncf %61 : vector<32x8xf32> to vector<32x8xbf16>
    %cst_28 = arith.constant dense<0.000000e+00> : vector<64x8xf32>
    %65 = tpu.matmul %63, %64, %cst_28 {dimension_numbers = #tpu.dot_dimension_numbers<[1], [0], [0], [1], [0, 0, 1, 1], [], []>} : vector<64x32xbf16>, vector<32x8xbf16>, vector<64x8xf32> -> vector<64x8xf32>
    %c3_29 = arith.constant 3 : index
    %c0_30 = arith.constant 0 : index
    %c0_31 = arith.constant 0 : index
    %66 = vector.load %arg4[%c3_29, %c0_30, %c0_31] : memref<4x64x1xf32, #tpu.memory_space<vmem>>, vector<1x64x1xf32>
    %67 = vector.shape_cast %66 : vector<1x64x1xf32> to vector<64x1xf32>
    %68 = vector.broadcast %67 : vector<64x1xf32> to vector<64x8xf32>
    %69 = arith.addf %65, %68 : vector<64x8xf32>
    %70 = vector.extract_strided_slice %69 {offsets = [0, 0], sizes = [32, 8], strides = [1, 1]} : vector<64x8xf32> to vector<32x8xf32>
    %cst_32 = arith.constant 0.000000e+00 : f32
    %71 = vector.broadcast %cst_32 : f32 to vector<32x8xf32>
    %72 = arith.maximumf %70, %71 : vector<32x8xf32>
    %73 = vector.extract_strided_slice %69 {offsets = [32, 0], sizes = [32, 8], strides = [1, 1]} : vector<64x8xf32> to vector<32x8xf32>
    %74 = arith.negf %73 : vector<32x8xf32>
    %75 = math.exp %74 : vector<32x8xf32>
    %cst_33 = arith.constant 1.000000e+00 : f32
    %76 = vector.broadcast %cst_33 : f32 to vector<32x8xf32>
    %77 = arith.addf %76, %75 : vector<32x8xf32>
    %78 = arith.divf %76, %77 : vector<32x8xf32>
    %79 = arith.subf %72, %61 : vector<32x8xf32>
    %80 = arith.mulf %78, %79 : vector<32x8xf32>
    %81 = arith.addf %61, %80 : vector<32x8xf32>
    %c0_34 = arith.constant 0 : index
    %c0_35 = arith.constant 0 : index
    %c0_36 = arith.constant 0 : index
    %82 = vector.load %arg5[%c0_34, %c0_35, %c0_36] : memref<1x32x8xf32, #tpu.memory_space<vmem>>, vector<1x32x8xf32>
    %83 = vector.shape_cast %82 : vector<1x32x8xf32> to vector<32x8xf32>
    %84 = vector.shape_cast %81 : vector<32x8xf32> to vector<1x32x8xf32>
    tpu.vector_store %arg5[%c0_34, %c0_35, %c0_36], %84 {strides = array<i32>} : memref<1x32x8xf32, #tpu.memory_space<vmem>>, vector<1x32x8xf32>,
    return
  }
  func.func @transform_0(%arg0: i32, %arg1: i32) -> (i32, i32, i32) {
    %c0_i32 = arith.constant 0 : i32
    %c0_i32_0 = arith.constant 0 : i32
    return %arg0, %c0_i32, %arg1 : i32, i32, i32
  }
  func.func @transform_1(%arg0: i32, %arg1: i32) -> (i32, i32, i32) {
    %c0_i32 = arith.constant 0 : i32
    %c0_i32_0 = arith.constant 0 : i32
    %c0_i32_1 = arith.constant 0 : i32
    %c0_i32_2 = arith.constant 0 : i32
    return %c0_i32, %c0_i32_0, %c0_i32_1 : i32, i32, i32
  }
  func.func @transform_2(%arg0: i32, %arg1: i32) -> (i32, i32, i32) {
    %c0_i32 = arith.constant 0 : i32
    %c0_i32_0 = arith.constant 0 : i32
    %c0_i32_1 = arith.constant 0 : i32
    %c0_i32_2 = arith.constant 0 : i32
    return %c0_i32, %c0_i32_0, %c0_i32_1 : i32, i32, i32
  }
  func.func @transform_3(%arg0: i32, %arg1: i32) -> (i32, i32, i32) {
    %c0_i32 = arith.constant 0 : i32
    %c0_i32_0 = arith.constant 0 : i32
    return %arg0, %c0_i32, %arg1 : i32, i32, i32
  }
}

</mosaic_0001>

<bundles_post_ra>
// kernel: tpu_custom_call.1
= control target key start
LH: loop header
LB: loop body
LE: loop exit
PB: predicated region body
PF: predicated region fallthrough
CT: control target
= control target key end

     0   :  { %s1415_s12 = smov 0   ;;  %s1417_s13 = smov 0   ;;  %s1695_s0 = inlined_call_operand.vmem [shape: f32[2,32,8], index: 0, kind: input, shape index: {}]   ;;  %s1696_s1 = inlined_call_operand.vmem [shape: bf16[4,64,32], index: 1, kind: input, shape index: {}]   ;;  %s1697_s2 = inlined_call_operand.vmem [shape: f32[4,64,1], index: 2, kind: input, shape index: {}]   ;;  %s1698_s3 = inlined_call_operand.vmem [shape: f32[2,32,8], index: 3, kind: output, shape index: {}]  }
   0x1   :  { %s1419_s14 = smov 0  }
   0x2 LB: > { %s25_s15 = sadd.s32 1, %s1388_s13  ;;  %p1086_p0 = scmp.ge.s32.totalorder %s1392_s14, 1  ;;  %s1392_s14 = sphi %s1419_s14, %s13_s14   ;;  %s1388_s13 = sphi %s1417_s13, %s1700_s13   ;;  %s1384_s12 = sphi %s1415_s12, %s1699_s12  }
   0x3   : > { %p27_p1 = scmp.ge.s32.totalorder %s25_s15, 2  ;;  %p156_p2 = scmp.lt.s32.totalorder %s1392_s14, 3 }
   0x5   : > { %s1702_s15 = smov (%p27_p1, %s25_s15), 0  ;;  %p157_p3 = pnand %p1086_p0, %p156_p2 }
   0x6   : > { %p186_p4 = scmp.lt.s32.totalorder (!%p157_p3), %s1384_s12, 1 }
   0x7   : > { %160 = sbr.rel (%p157_p3) target bundleno = 1031 (0x407), region = 32 }
   0xc   : > { %v1290_v0 = vld [vmem:[%s1696_s1] sm:$0xff]   ;;  %vm285_vm0 = vcmask 261120   ;;  %s1704_s12 = smov (!%p186_p4, %s1384_s12), 1  ;;  %v1394_v1 = vmov 0   ;;  %v223_v2 = vld [vmem:[%s1697_s2 + $0x30] sm:$0xff]  ;;  %v224_v4 = vld [vmem:[%s1697_s2 + $0x38] sm:$0xff] }
   0xd   : > { %1219 = vmatprep.mubr.msk.bf16.mxu0 %vm285_vm0, %v1290_v0  ;;  %s1189_s18 = sshll.u32 %s1704_s12, 5  ;;  %1288 = vset.pattern.permute.xlu0 %v1394_v1  ;;  %v221_v3 = vld [vmem:[%s1697_s2 + $0x20] sm:$0xff]  ;;  %v222_v10 = vld [vmem:[%s1697_s2 + $0x28] sm:$0xff]  ;;  %v219_v12 = vld [vmem:[%s1697_s2 + $0x10] sm:$0xff]  ;;  %vm994_vm1 = vcmask 64512  }
   0xe   : > { %1289 = vset.pattern.permute.xlu1 %v1394_v1  ;;  %s193_s25 = scalar_lea.vmem %s1695_s0, %s1189_s18  ;;  %257 = vperm.xlu0 %1288, %v223_v2   ;;  %v220_v13 = vld [vmem:[%s1697_s2 + $0x18] sm:$0xff]  ;;  %v1291_v14 = vld [vmem:[%s1696_s1 + $0x8] sm:$0xff]   ;;  %v1292_v15 = vld [vmem:[%s1696_s1 + $0x10] sm:$0xff]   ;;  %s201_s30 = scalar_lea.vmem %s1698_s3, %s1189_s18 }
   0xf   : > { %247 = vperm.xlu1 %1289, %v221_v3   ;;  %v1454_v5 = vld [vmem:[%s193_s25 + $0x10] sm:$0xff]  ;;  %v1456_v6 = vld [vmem:[%s193_s25 + $0x18] sm:$0xff]  ;;  %v1458_v7 = vld [vmem:[%s193_s25] sm:$0xff] }
  0x10   : > { %v216_v8 = vpack.c.bf16 %v1456_v6, %v1454_v5  ;;  %v1462_v9 = vld [vmem:[%s193_s25 + $0x8] sm:$0xff]  ;;  %v217_v16 = vld [vmem:[%s1697_s2] sm:$0xff]  ;;  %v1117_v18 = vld [vmem:[%s1697_s2 + $0x70] sm:$0xff] }
  0x11   : > { %v215_v11 = vpack.c.bf16 %v1462_v9, %v1458_v7  ;;  %v218_v17 = vld [vmem:[%s1697_s2 + $0x8] sm:$0xff]  ;;  %v1118_v19 = vld [vmem:[%s1697_s2 + $0x78] sm:$0xff]  ;;  %v1115_v21 = vld [vmem:[%s1697_s2 + $0x60] sm:$0xff] }
  0x12   : > { %1215 = vmatprep.subr.bf16.mxu0 %v216_v8  ;;  %262 = vperm.xlu0 %1288, %v224_v4   ;;  %v1293_v20 = vld [vmem:[%s1696_s1 + $0x18] sm:$0xff]   ;;  %v1116_v22 = vld [vmem:[%s1697_s2 + $0x68] sm:$0xff]  ;;  %v1113_v23 = vld [vmem:[%s1697_s2 + $0x50] sm:$0xff] }
  0x13   : > { %1216 = vmatpush3.bf16.msra.mxu0 %v216_v8  ;;  %252 = vperm.xlu1 %1289, %v222_v10   ;;  %v1114_v24 = vld [vmem:[%s1697_s2 + $0x58] sm:$0xff]  ;;  %v1111_v25 = vld [vmem:[%s1697_s2 + $0x40] sm:$0xff]  ;;  %v1112_v26 = vld [vmem:[%s1697_s2 + $0x48] sm:$0xff] }
  0x14   : > { %1217 = vmatprep.subr.bf16.mxu0 %v215_v11  ;;  %v1145_v27 = vld [vmem:[%s1697_s2 + $0xb0] sm:$0xff]  ;;  %v1146_v28 = vld [vmem:[%s1697_s2 + $0xb8] sm:$0xff]  ;;  %v1143_v29 = vld [vmem:[%s1697_s2 + $0xa0] sm:$0xff] }
  0x15   : > { %v1144_v30 = vld [vmem:[%s1697_s2 + $0xa8] sm:$0xff]  ;;  %v1141_v31 = vld [vmem:[%s1697_s2 + $0x90] sm:$0xff]  ;;  %v1142_v32 = vld [vmem:[%s1697_s2 + $0x98] sm:$0xff] }
  0x16   : > { %237 = vperm.xlu0 %1288, %v219_v12   ;;  %v1139_v33 = vld [vmem:[%s1697_s2 + $0x80] sm:$0xff]  ;;  %v1140_v34 = vld [vmem:[%s1697_s2 + $0x88] sm:$0xff]  ;;  %v1173_v37 = vld [vmem:[%s1697_s2 + $0xf0] sm:$0xff] }
  0x17   : > { %1218 = vmatpush3.bf16.msra.mxu0 %v215_v11  ;;  %242 = vperm.xlu1 %1289, %v220_v13   ;;  %v1171_v35 = vld [vmem:[%s1697_s2 + $0xe0] sm:$0xff]  ;;  %v1172_v36 = vld [vmem:[%s1697_s2 + $0xe8] sm:$0xff]  ;;  %v1174_v38 = vld [vmem:[%s1697_s2 + $0xf8] sm:$0xff] }
  0x18   : > { %v1167_v39 = vld [vmem:[%s1697_s2 + $0xc0] sm:$0xff]  ;;  %v1168_v40 = vld [vmem:[%s1697_s2 + $0xc8] sm:$0xff]  ;;  %v1169_v41 = vld [vmem:[%s1697_s2 + $0xd0] sm:$0xff] }
  0x19   : > { %v1170_v42 = vld [vmem:[%s1697_s2 + $0xd8] sm:$0xff]  ;;  %v1294_v43 = vld [vmem:[%s1696_s1 + $0x20] sm:$0xff]  }
  0x1a   : > { %1220 = vmatmul.mubr.msk.bf16.vlgmr.msra.gmra.mxu0 %vm285_vm0, %v1291_v14  ;;  %227 = vperm.xlu0 %1288, %v217_v16  }
  0x1b   : > { %1223 = vmatprep.mubr.msk.bf16.mxu0 %vm285_vm0, %v1292_v15  ;;  %232 = vperm.xlu1 %1289, %v218_v17  }
  0x1c   : > { %1231 = vmatprep.mubr.msk.bf16.mxu1 %vm285_vm0, %v1294_v43 }
  0x1e   : > { %455 = vperm.xlu0 %1288, %v1117_v18  }
  0x1f   : > { %460 = vperm.xlu1 %1289, %v1118_v19  }
  0x22   : > { %1224 = vmatmul.mubr.msk.bf16.gmra.mxu0 %vm285_vm0, %v1293_v20  ;;  %445 = vperm.xlu0 %1288, %v1115_v21  }
  0x23   : > { %450 = vperm.xlu1 %1289, %v1116_v22  }
  0x26   : > { %435 = vperm.xlu0 %1288, %v1113_v23  }
  0x27   : > { %440 = vperm.xlu1 %1289, %v1114_v24  }
  0x2a   : > { %425 = vperm.xlu0 %1288, %v1111_v25  }
  0x2b   : > { %430 = vperm.xlu1 %1289, %v1112_v26  }
  0x2e   : > { %652 = vperm.xlu0 %1288, %v1145_v27  }
  0x2f   : > { %657 = vperm.xlu1 %1289, %v1146_v28  }
  0x32   : > { %642 = vperm.xlu0 %1288, %v1143_v29  }
  0x33   : > { %647 = vperm.xlu1 %1289, %v1144_v30  }
  0x36   : > { %632 = vperm.xlu0 %1288, %v1141_v31  }
  0x37   : > { %637 = vperm.xlu1 %1289, %v1142_v32  }
  0x3a   : > { %622 = vperm.xlu0 %1288, %v1139_v33  }
  0x3b   : > { %627 = vperm.xlu1 %1289, %v1140_v34  }
  0x3e   : > { %839 = vperm.xlu0 %1288, %v1171_v35  }
  0x3f   : > { %844 = vperm.xlu1 %1289, %v1172_v36  }
  0x42   : > { %849 = vperm.xlu0 %1288, %v1173_v37  }
  0x43   : > { %854 = vperm.xlu1 %1289, %v1174_v38  }
  0x46   : > { %819 = vperm.xlu0 %1288, %v1167_v39  }
  0x47   : > { %824 = vperm.xlu1 %1289, %v1168_v40  }
  0x4a   : > { %829 = vperm.xlu0 %1288, %v1169_v41  }
  0x4b   : > { %834 = vperm.xlu1 %1289, %v1170_v42  }
  0x89   : > { %v258_v47 = vpop.permute.xlu0 %257 }
  0x8a   : > { %v248_v49 = vpop.permute.xlu1 %247 }
  0x8d   : > { %v263_v55 = vpop.permute.xlu0 %262 }
  0x8e   : > { %v253_v59 = vpop.permute.xlu1 %252 }
  0x91   : > { %v238_v8 = vpop.permute.xlu0 %237 }
  0x92   : > { %v243_v12 = vpop.permute.xlu1 %242 }
  0x95   : > { %v228_v15 = vpop.permute.xlu0 %227 }
  0x96   : > { %v233_v18 = vpop.permute.xlu1 %232 }
  0xda   : > { %v1221_v44 = vpop.f32.mrf.mxu0 }
  0xdb   : > { %v341_v14 = vadd.f32 %v1221_v44, %v238_v8  ;;  %v456_v44 = vpop.permute.xlu0 %455 }
  0xdc   : > { %v332_v45 = vpop.f32.mrf.mxu0 }
  0xdd   : > { %v333_v16 = vadd.f32 %v332_v45, %v228_v15  ;;  %v365_v19 = vmax.f32 %v341_v14, 0.0 }
  0xde   : > { %v1222_v46 = vpop.f32.mrf.mxu0 }
  0xdf   : > { %v344_v17 = vadd.f32 %v1222_v46, %v243_v12  ;;  %v363_v21 = vmax.f32 %v333_v16, 0.0  ;;  %v393_v24 = vsub.f32 %v365_v19, %v1454_v5 }
  0xe0   : > { %v335_v48 = vpop.f32.mrf.mxu0 }
  0xe1   : > { %v336_v20 = vadd.f32 %v335_v48, %v233_v18  ;;  %v366_v22 = vmax.f32 %v344_v17, 0.0  ;;  %v391_v27 = vsub.f32 %v363_v21, %v1458_v7 }
  0xe2   : > { %v1225_v50 = vpop.f32.mrf.mxu0 }
  0xe3   : > { %v357_v51 = vadd.f32 %v1225_v50, %v258_v47  ;;  %v364_v25 = vmax.f32 %v336_v20, 0.0  ;;  %v394_v28 = vsub.f32 %v366_v22, %v1456_v6  ;;  %v461_v47 = vpop.permute.xlu1 %460  ;;  %v446_v50 = vpop.permute.xlu0 %445 }
  0xe4   : > { %v348_v52 = vpop.f32.mrf.mxu0 }
  0xe5   : > { %v1101_v53 = vmul.f32 -1.442695, %v357_v51  ;;  %v349_v54 = vadd.f32 %v348_v52, %v248_v49  ;;  %v392_v31 = vsub.f32 %v364_v25, %v1462_v9 }
  0xe6   : > { %v1226_v56 = vpop.f32.mrf.mxu0 }
  0xe7   : > { %1306 = vpow2.f32 %v1101_v53  ;;  %v1099_v57 = vmul.f32 -1.442695, %v349_v54  ;;  %v360_v58 = vadd.f32 %v1226_v56, %v263_v55 }
  0xe8   : > { %v351_v60 = vpop.f32.mrf.mxu0 }
  0xe9   : > { %1308 = vpow2.f32 %v1099_v57  ;;  %v1102_v61 = vmul.f32 -1.442695, %v360_v58  ;;  %v352_v62 = vadd.f32 %v351_v60, %v253_v59  ;;  %v451_v57 = vpop.permute.xlu1 %450 }
  0xeb   : > { %1310 = vpow2.f32 %v1102_v61  ;;  %v1100_v63 = vmul.f32 -1.442695, %v352_v62 }
  0xed   : > { %1312 = vpow2.f32 %v1100_v63 }
  0xf4   : > { %v1307_v0 = vpop.eup %1306 }
  0xf5   : > { %v381_v1 = vadd.f32 1.0, %v1307_v0 }
  0xf6   : > { %v1309_v2 = vpop.eup %1308 }
  0xf7   : > { %1314 = vrcp.f32 %v381_v1  ;;  %v379_v3 = vadd.f32 1.0, %v1309_v2 }
  0xf8   : > { %v1311_v4 = vpop.eup %1310 }
  0xf9   : > { %1316 = vrcp.f32 %v379_v3  ;;  %v382_v10 = vadd.f32 1.0, %v1311_v4  ;;  %v436_v3 = vpop.permute.xlu0 %435 }
  0xfa   : > { %v1313_v11 = vpop.eup %1312 }
  0xfb   : > { %1318 = vrcp.f32 %v382_v10  ;;  %v380_v13 = vadd.f32 1.0, %v1313_v11  ;;  %v441_v10 = vpop.permute.xlu1 %440 }
  0xfd   : > { %1320 = vrcp.f32 %v380_v13  ;;  %v426_v13 = vpop.permute.xlu0 %425 }
  0xff   : > { %v431_v16 = vpop.permute.xlu1 %430 }
 0x104   : > { %v1315_v23 = vpop.eup %1314 }
 0x105   : > { %v397_v29 = vmul.f32 %v1315_v23, %v393_v24 }
 0x106   : > { %v1317_v26 = vpop.eup %1316 }
 0x107   : > { %v395_v33 = vmul.f32 %v1317_v26, %v391_v27  ;;  %v1574_v35 = vadd.f32 %v397_v29, %v1454_v5  ;;  %v1295_v5 = vld [vmem:[%s1696_s1 + $0x28] sm:$0xff]  }
 0x108   : > { %v1319_v30 = vpop.eup %1318 }
 0x109   : > { %v398_v32 = vmul.f32 %v1319_v30, %v394_v28  ;;  %v1582_v39 = vadd.f32 %v395_v33, %v1458_v7  ;;  %v1297_v7 = vld [vmem:[%s1696_s1 + $0x38] sm:$0xff]  }
 0x10a   : > { %v1321_v34 = vpop.eup %1320 }
 0x10b   : > { %v1577_v36 = vadd.f32 %v398_v32, %v1456_v6  ;;  %v396_v37 = vmul.f32 %v1321_v34, %v392_v31  ;;  %v1296_v6 = vld [vmem:[%s1696_s1 + $0x30] sm:$0xff]  }
 0x10d   : > { %v413_v38 = vpack.c.bf16 %v1577_v36, %v1574_v35  ;;  %v1585_v40 = vadd.f32 %v396_v37, %v1462_v9  ;;  %v1298_v9 = vld [vmem:[%s1696_s1 + $0x40] sm:$0xff]  }
 0x10e   : > { %1243 = vmatprep.mubr.msk.bf16.mxu0 %vm285_vm0, %v1298_v9 }
 0x10f   : > { %1227 = vmatprep.subr.bf16.mxu1 %v413_v38  ;;  %v412_v41 = vpack.c.bf16 %v1585_v40, %v1582_v39 }
 0x110   : > { %1228 = vmatpush3.bf16.msra.mxu1 %v413_v38 }
 0x111   : > { %1229 = vmatprep.subr.bf16.mxu1 %v412_v41 }
 0x114   : > { %1230 = vmatpush3.bf16.msra.mxu1 %v412_v41 }
 0x117   : > { %1232 = vmatmul.mubr.msk.bf16.vlgmr.msra.gmra.mxu1 %vm285_vm0, %v1295_v5 }
 0x118   : > { %1235 = vmatprep.mubr.msk.bf16.mxu1 %vm285_vm0, %v1296_v6 }
 0x11f   : > { %1236 = vmatmul.mubr.msk.bf16.gmra.mxu1 %vm285_vm0, %v1297_v7 }
 0x1d7   : > { %v1233_v42 = vpop.f32.mrf.mxu1 }
 0x1d8   : > { %v538_v12 = vadd.f32 %v1233_v42, %v436_v3  ;;  %v653_v42 = vpop.permute.xlu0 %652 }
 0x1d9   : > { %v529_v43 = vpop.f32.mrf.mxu1 }
 0x1da   : > { %v530_v14 = vadd.f32 %v529_v43, %v426_v13  ;;  %v562_v17 = vmax.f32 %v538_v12, 0.0 }
 0x1db   : > { %v1234_v45 = vpop.f32.mrf.mxu1 }
 0x1dc   : > { %v541_v15 = vadd.f32 %v1234_v45, %v441_v10  ;;  %v560_v19 = vmax.f32 %v530_v14, 0.0  ;;  %v590_v22 = vsub.f32 %v562_v17, %v1574_v35  ;;  %v658_v45 = vpop.permute.xlu1 %657 }
 0x1dd   : > { %v532_v46 = vpop.f32.mrf.mxu1 }
 0x1de   : > { %v533_v18 = vadd.f32 %v532_v46, %v431_v16  ;;  %v563_v20 = vmax.f32 %v541_v15, 0.0  ;;  %v588_v25 = vsub.f32 %v560_v19, %v1582_v39 }
 0x1df   : > { %v1237_v48 = vpop.f32.mrf.mxu1 }
 0x1e0   : > { %v554_v49 = vadd.f32 %v1237_v48, %v456_v44  ;;  %v561_v23 = vmax.f32 %v533_v18, 0.0  ;;  %v591_v26 = vsub.f32 %v563_v20, %v1577_v36  ;;  %v643_v48 = vpop.permute.xlu0 %642 }
 0x1e1   : > { %v545_v51 = vpop.f32.mrf.mxu1 }
 0x1e2   : > { %v1129_v52 = vmul.f32 -1.442695, %v554_v49  ;;  %v546_v53 = vadd.f32 %v545_v51, %v446_v50  ;;  %v589_v29 = vsub.f32 %v561_v23, %v1585_v40 }
 0x1e3   : > { %v1238_v54 = vpop.f32.mrf.mxu1 }
 0x1e4   : > { %1322 = vpow2.f32 %v1129_v52  ;;  %v1127_v55 = vmul.f32 -1.442695, %v546_v53  ;;  %v557_v56 = vadd.f32 %v1238_v54, %v461_v47 }
 0x1e5   : > { %v548_v58 = vpop.f32.mrf.mxu1 }
 0x1e6   : > { %1324 = vpow2.f32 %v1127_v55  ;;  %v1130_v59 = vmul.f32 -1.442695, %v557_v56  ;;  %v549_v60 = vadd.f32 %v548_v58, %v451_v57  ;;  %v648_v55 = vpop.permute.xlu1 %647 }
 0x1e8   : > { %1326 = vpow2.f32 %v1130_v59  ;;  %v1128_v61 = vmul.f32 -1.442695, %v549_v60 }
 0x1ea   : > { %1328 = vpow2.f32 %v1128_v61 }
 0x1f1   : > { %v1323_v62 = vpop.eup %1322 }
 0x1f2   : > { %v578_v63 = vadd.f32 1.0, %v1323_v62 }
 0x1f3   : > { %v1325_v0 = vpop.eup %1324 }
 0x1f4   : > { %1330 = vrcp.f32 %v578_v63  ;;  %v576_v1 = vadd.f32 1.0, %v1325_v0 }
 0x1f5   : > { %v1327_v2 = vpop.eup %1326 }
 0x1f6   : > { %1332 = vrcp.f32 %v576_v1  ;;  %v579_v4 = vadd.f32 1.0, %v1327_v2  ;;  %v633_v1 = vpop.permute.xlu0 %632 }
 0x1f7   : > { %v1329_v8 = vpop.eup %1328 }
 0x1f8   : > { %1334 = vrcp.f32 %v579_v4  ;;  %v577_v11 = vadd.f32 1.0, %v1329_v8  ;;  %v638_v4 = vpop.permute.xlu1 %637 }
 0x1fa   : > { %1336 = vrcp.f32 %v577_v11  ;;  %v623_v11 = vpop.permute.xlu0 %622 }
 0x1fc   : > { %v628_v14 = vpop.permute.xlu1 %627 }
 0x201   : > { %v1331_v21 = vpop.eup %1330 }
 0x202   : > { %v594_v27 = vmul.f32 %v1331_v21, %v590_v22 }
 0x203   : > { %v1333_v24 = vpop.eup %1332 }
 0x204   : > { %v592_v31 = vmul.f32 %v1333_v24, %v588_v25  ;;  %v1610_v33 = vadd.f32 %v594_v27, %v1574_v35  ;;  %v1299_v35 = vld [vmem:[%s1696_s1 + $0x48] sm:$0xff]  }
 0x205   : > { %v1335_v28 = vpop.eup %1334 }
 0x206   : > { %v595_v30 = vmul.f32 %v1335_v28, %v591_v26  ;;  %v1618_v41 = vadd.f32 %v592_v31, %v1582_v39  ;;  %v1301_v39 = vld [vmem:[%s1696_s1 + $0x58] sm:$0xff]  }
 0x207   : > { %v1337_v32 = vpop.eup %1336 }
 0x208   : > { %v1613_v34 = vadd.f32 %v595_v30, %v1577_v36  ;;  %v593_v37 = vmul.f32 %v1337_v32, %v589_v29  ;;  %v1300_v36 = vld [vmem:[%s1696_s1 + $0x50] sm:$0xff]  }
 0x20a   : > { %v610_v38 = vpack.c.bf16 %v1613_v34, %v1610_v33  ;;  %v1621_v5 = vadd.f32 %v593_v37, %v1585_v40  ;;  %v1302_v40 = vld [vmem:[%s1696_s1 + $0x60] sm:$0xff]  }
 0x20b   : > { %1255 = vmatprep.mubr.msk.bf16.mxu1 %vm285_vm0, %v1302_v40 }
 0x20c   : > { %1239 = vmatprep.subr.bf16.mxu0 %v610_v38  ;;  %v609_v6 = vpack.c.bf16 %v1621_v5, %v1618_v41 }
 0x20d   : > { %1240 = vmatpush3.bf16.msra.mxu0 %v610_v38 }
 0x20e   : > { %1241 = vmatprep.subr.bf16.mxu0 %v609_v6 }
 0x211   : > { %1242 = vmatpush3.bf16.msra.mxu0 %v609_v6 }
 0x214   : > { %1244 = vmatmul.mubr.msk.bf16.vlgmr.msra.gmra.mxu0 %vm285_vm0, %v1299_v35 }
 0x215   : > { %1247 = vmatprep.mubr.msk.bf16.mxu0 %vm285_vm0, %v1300_v36 }
 0x21c   : > { %1248 = vmatmul.mubr.msk.bf16.gmra.mxu0 %vm285_vm0, %v1301_v39  ;;  %v840_v39 = vpop.permute.xlu0 %839 }
 0x2d4   : > { %v1245_v7 = vpop.f32.mrf.mxu0 }
 0x2d5   : > { %v735_v10 = vadd.f32 %v1245_v7, %v633_v1 }
 0x2d6   : > { %v726_v9 = vpop.f32.mrf.mxu0 }
 0x2d7   : > { %v727_v12 = vadd.f32 %v726_v9, %v623_v11  ;;  %v759_v15 = vmax.f32 %v735_v10, 0.0  ;;  %v845_v9 = vpop.permute.xlu1 %844 }
 0x2d8   : > { %v1246_v43 = vpop.f32.mrf.mxu0 }
 0x2d9   : > { %v738_v13 = vadd.f32 %v1246_v43, %v638_v4  ;;  %v757_v17 = vmax.f32 %v727_v12, 0.0  ;;  %v787_v20 = vsub.f32 %v759_v15, %v1610_v33  ;;  %v850_v43 = vpop.permute.xlu0 %849 }
 0x2da   : > { %v729_v44 = vpop.f32.mrf.mxu0 }
 0x2db   : > { %v730_v16 = vadd.f32 %v729_v44, %v628_v14  ;;  %v760_v18 = vmax.f32 %v738_v13, 0.0  ;;  %v785_v23 = vsub.f32 %v757_v17, %v1618_v41 }
 0x2dc   : > { %v1249_v46 = vpop.f32.mrf.mxu0 }
 0x2dd   : > { %v751_v47 = vadd.f32 %v1249_v46, %v653_v42  ;;  %v758_v21 = vmax.f32 %v730_v16, 0.0  ;;  %v788_v24 = vsub.f32 %v760_v18, %v1613_v34 }
 0x2de   : > { %v742_v49 = vpop.f32.mrf.mxu0 }
 0x2df   : > { %v1157_v50 = vmul.f32 -1.442695, %v751_v47  ;;  %v743_v51 = vadd.f32 %v742_v49, %v643_v48  ;;  %v786_v27 = vsub.f32 %v758_v21, %v1621_v5  ;;  %v855_v49 = vpop.permute.xlu1 %854 }
 0x2e0   : > { %v1250_v52 = vpop.f32.mrf.mxu0 }
 0x2e1   : > { %1338 = vpow2.f32 %v1157_v50  ;;  %v1155_v53 = vmul.f32 -1.442695, %v743_v51  ;;  %v754_v54 = vadd.f32 %v1250_v52, %v658_v45 }
 0x2e2   : > { %v745_v56 = vpop.f32.mrf.mxu0 }
 0x2e3   : > { %1340 = vpow2.f32 %v1155_v53  ;;  %v1158_v57 = vmul.f32 -1.442695, %v754_v54  ;;  %v746_v58 = vadd.f32 %v745_v56, %v648_v55 }
 0x2e5   : > { %1342 = vpow2.f32 %v1158_v57  ;;  %v1156_v59 = vmul.f32 -1.442695, %v746_v58  ;;  %v820_v58 = vpop.permute.xlu0 %819 }
 0x2e7   : > { %1344 = vpow2.f32 %v1156_v59 }
 0x2ee   : > { %v1339_v60 = vpop.eup %1338 }
 0x2ef   : > { %v775_v61 = vadd.f32 1.0, %v1339_v60 }
 0x2f0   : > { %v1341_v62 = vpop.eup %1340 }
 0x2f1   : > { %1346 = vrcp.f32 %v775_v61  ;;  %v773_v63 = vadd.f32 1.0, %v1341_v62 }
 0x2f2   : > { %v1343_v0 = vpop.eup %1342 }
 0x2f3   : > { %1348 = vrcp.f32 %v773_v63  ;;  %v776_v2 = vadd.f32 1.0, %v1343_v0  ;;  %v825_v63 = vpop.permute.xlu1 %824 }
 0x2f4   : > { %v1345_v3 = vpop.eup %1344 }
 0x2f5   : > { %1350 = vrcp.f32 %v776_v2  ;;  %v774_v8 = vadd.f32 1.0, %v1345_v3  ;;  %v830_v2 = vpop.permute.xlu0 %829 }
 0x2f7   : > { %1352 = vrcp.f32 %v774_v8  ;;  %v835_v10 = vpop.permute.xlu1 %834 }
 0x2fe   : > { %v1347_v19 = vpop.eup %1346 }
 0x2ff   : > { %v791_v25 = vmul.f32 %v1347_v19, %v787_v20 }
 0x300   : > { %v1349_v22 = vpop.eup %1348 }
 0x301   : > { %v789_v29 = vmul.f32 %v1349_v22, %v785_v23  ;;  %v1646_v31 = vadd.f32 %v791_v25, %v1610_v33  ;;  %v1303_v33 = vld [vmem:[%s1696_s1 + $0x68] sm:$0xff]  }
 0x302   : > { %v1351_v26 = vpop.eup %1350 }
 0x303   : > { %v792_v28 = vmul.f32 %v1351_v26, %v788_v24  ;;  %v1654_v6 = vadd.f32 %v789_v29, %v1618_v41  ;;  %v1305_v41 = vld [vmem:[%s1696_s1 + $0x78] sm:$0xff]  }
 0x304   : > { %v1353_v30 = vpop.eup %1352 }
 0x305   : > { %v1649_v32 = vadd.f32 %v792_v28, %v1613_v34  ;;  %v790_v37 = vmul.f32 %v1353_v30, %v786_v27  ;;  %v1304_v34 = vld [vmem:[%s1696_s1 + $0x70] sm:$0xff]  }
 0x307   : > { %v807_v38 = vpack.c.bf16 %v1649_v32, %v1646_v31  ;;  %v1657_v35 = vadd.f32 %v790_v37, %v1621_v5 }
 0x309   : > { %1251 = vmatprep.subr.bf16.mxu1 %v807_v38  ;;  %v806_v36 = vpack.c.bf16 %v1657_v35, %v1654_v6 }
 0x30a   : > { %1252 = vmatpush3.bf16.msra.mxu1 %v807_v38 }
 0x30b   : > { %1253 = vmatprep.subr.bf16.mxu1 %v806_v36 }
 0x30e   : > { %1254 = vmatpush3.bf16.msra.mxu1 %v806_v36 }
 0x311   : > { %1256 = vmatmul.mubr.msk.bf16.vlgmr.msra.gmra.mxu1 %vm285_vm0, %v1303_v33 }
 0x312   : > { %1259 = vmatprep.mubr.msk.bf16.mxu1 %vm285_vm0, %v1304_v34 }
 0x319   : > { %1260 = vmatmul.mubr.msk.bf16.gmra.mxu1 %vm285_vm0, %v1305_v41 }
 0x3d1   : > { %v1257_v5 = vpop.f32.mrf.mxu1 }
 0x3d2   : > { %v932_v3 = vadd.f32 %v1257_v5, %v830_v2 }
 0x3d3   : > { %v923_v40 = vpop.f32.mrf.mxu1 }
 0x3d4   : > { %v924_v8 = vadd.f32 %v923_v40, %v820_v58  ;;  %v956_v11 = vmax.f32 %v932_v3, 0.0 }
 0x3d5   : > { %v1258_v7 = vpop.f32.mrf.mxu1 }
 0x3d6   : > { %v935_v12 = vadd.f32 %v1258_v7, %v835_v10  ;;  %v954_v13 = vmax.f32 %v924_v8, 0.0  ;;  %v984_v15 = vsub.f32 %v956_v11, %v1646_v31 }
 0x3d7   : > { %v926_v42 = vpop.f32.mrf.mxu1 }
 0x3d8   : > { %v927_v14 = vadd.f32 %v926_v42, %v825_v63  ;;  %v957_v16 = vmax.f32 %v935_v12, 0.0  ;;  %v982_v18 = vsub.f32 %v954_v13, %v1654_v6 }
 0x3d9   : > { %v1261_v44 = vpop.f32.mrf.mxu1 }
 0x3da   : > { %v948_v45 = vadd.f32 %v1261_v44, %v850_v43  ;;  %v955_v19 = vmax.f32 %v927_v14, 0.0  ;;  %v985_v22 = vsub.f32 %v957_v16, %v1649_v32 }
 0x3db   : > { %v939_v46 = vpop.f32.mrf.mxu1 }
 0x3dc   : > { %v1185_v47 = vmul.f32 -1.442695, %v948_v45  ;;  %v940_v48 = vadd.f32 %v939_v46, %v840_v39  ;;  %v983_v26 = vsub.f32 %v955_v19, %v1657_v35 }
 0x3dd   : > { %v1262_v50 = vpop.f32.mrf.mxu1 }
 0x3de   : > { %1354 = vpow2.f32 %v1185_v47  ;;  %v1183_v51 = vmul.f32 -1.442695, %v940_v48  ;;  %v951_v52 = vadd.f32 %v1262_v50, %v855_v49 }
 0x3df   : > { %v942_v53 = vpop.f32.mrf.mxu1 }
 0x3e0   : > { %1356 = vpow2.f32 %v1183_v51  ;;  %v1186_v54 = vmul.f32 -1.442695, %v951_v52  ;;  %v943_v55 = vadd.f32 %v942_v53, %v845_v9 }
 0x3e2   : > { %1358 = vpow2.f32 %v1186_v54  ;;  %v1184_v56 = vmul.f32 -1.442695, %v943_v55 }
 0x3e4   : > { %1360 = vpow2.f32 %v1184_v56 }
 0x3eb   : > { %v1355_v57 = vpop.eup %1354 }
 0x3ec   : > { %v972_v59 = vadd.f32 1.0, %v1355_v57 }
 0x3ed   : > { %v1357_v60 = vpop.eup %1356 }
 0x3ee   : > { %1362 = vrcp.f32 %v972_v59  ;;  %v970_v61 = vadd.f32 1.0, %v1357_v60 }
 0x3ef   : > { %v1359_v62 = vpop.eup %1358 }
 0x3f0   : > { %1364 = vrcp.f32 %v970_v61  ;;  %v973_v0 = vadd.f32 1.0, %v1359_v62 }
 0x3f1   : > { %v1361_v1 = vpop.eup %1360 }
 0x3f2   : > { %1366 = vrcp.f32 %v973_v0  ;;  %v971_v4 = vadd.f32 1.0, %v1361_v1 }
 0x3f4   : > { %1368 = vrcp.f32 %v971_v4 }
 0x3fb   : > { %v1363_v17 = vpop.eup %1362 }
 0x3fc   : > { %v988_v20 = vmul.f32 %v1363_v17, %v984_v15 }
 0x3fd   : > { %v1365_v21 = vpop.eup %1364 }
 0x3fe   : > { %v992_v23 = vadd.f32 %v988_v20, %v1646_v31  ;;  %v986_v24 = vmul.f32 %v1365_v21, %v982_v18 }
 0x3ff   : > { %v1367_v25 = vpop.eup %1366 }
 0x400   : > { %997 = vst.msk [vmem:[%s201_s30 + $0x10] sm:$0xff] %vm994_vm1, %v992_v23  ;;  %v990_v27 = vadd.f32 %v986_v24, %v1654_v6  ;;  %v989_v28 = vmul.f32 %v1367_v25, %v985_v22 }
 0x401   : > { %v1369_v29 = vpop.eup %1368 }
 0x402   : > { %995 = vst.msk [vmem:[%s201_s30] sm:$0xff] %vm994_vm1, %v990_v27  ;;  %v993_v30 = vadd.f32 %v989_v28, %v1649_v32  ;;  %v987_v37 = vmul.f32 %v1369_v29, %v983_v26 }
 0x404   : > { %998 = vst.msk [vmem:[%s201_s30 + $0x18] sm:$0xff] %vm994_vm1, %v993_v30  ;;  %v991_v38 = vadd.f32 %v987_v37, %v1657_v35 }
 0x406   : > { %996 = vst.msk [vmem:[%s201_s30 + $0x8] sm:$0xff] %vm994_vm1, %v991_v38 }
 0x407 PF: > { %s13_s14 = sadd.s32 1, %s1392_s14   ;;  %s1699_s12 = smov %s1388_s13 }
 0x408   : > { %p10_p5 = scmp.ge.s32.totalorder %s13_s14, 4   ;;  %s1700_s13 = smov %s1702_s15 }
 0x40a   :  { %12 = sbr.rel (!%p10_p5) target bundleno = 2 (0x2), region = 68 }

</bundles_post_ra>
